<compile_context>
chip_gen: v5e
topology: v5e:2x2
jax: 0.10.0
libtpu: 0.0.40
codegen_flags: <defaults>
</compile_context>

<pallas_src>
import functools

import jax
import jax.numpy as jnp
from jax.experimental import pallas as pl
from jax.experimental.pallas import tpu as pltpu


def _round_up(v, m):
    return (v + m - 1) // m * m


# ---------------------------------------------------------------------------
# Kernel 1 (layer 1 + fused heads' weight matmul), grid = (row tile i, K tile k)
#   acc += (A+I)[i,k] @ (D^{-1/2} X W1)[k]
#   epilogue: h   = relu(dinv_row * acc + b1)
#             HW' = dinv_row * (h @ [W2 | W3])      (pre-scaled for layer 2)
# ---------------------------------------------------------------------------
def gcn_layer1_kernel(a_ref, xw1_ref, dinv_ref, b1_ref, w23_ref, hw_ref, acc_ref):
    k = pl.program_id(1)

    @pl.when(k == 0)
    def _init():
        acc_ref[...] = jnp.zeros_like(acc_ref)

    acc_ref[...] += jnp.dot(a_ref[...], xw1_ref[...],
                            preferred_element_type=jnp.float32)

    @pl.when(k == pl.num_programs(1) - 1)
    def _epilogue():
        d = dinv_ref[...]                                        # (tm, 1) f32
        h = jnp.maximum(d * acc_ref[...] + b1_ref[...], 0.0)
        hw = jnp.dot(h.astype(w23_ref.dtype), w23_ref[...],
                     preferred_element_type=jnp.float32)
        hw_ref[...] = (d * hw).astype(hw_ref.dtype)


# ---------------------------------------------------------------------------
# Kernel 2 (layer-2 aggregation for the fused mu|logvar head)
#   acc += (A+I)[i,k] @ HW'[k]
#   epilogue: OUT = dinv_row * acc + [b2 | b3]
# ---------------------------------------------------------------------------
def gcn_layer2_kernel(a_ref, hw_ref, dinv_ref, b23_ref, out_ref, acc_ref):
    k = pl.program_id(1)

    @pl.when(k == 0)
    def _init():
        acc_ref[...] = jnp.zeros_like(acc_ref)

    acc_ref[...] += jnp.dot(a_ref[...], hw_ref[...],
                            preferred_element_type=jnp.float32)

    @pl.when(k == pl.num_programs(1) - 1)
    def _epilogue():
        out_ref[...] = (dinv_ref[...] * acc_ref[...]
                        + b23_ref[...]).astype(out_ref.dtype)


# ---------------------------------------------------------------------------
# Tiling geometry: tm rows x tk cols of A per grid step; both divide n_pad.
# ---------------------------------------------------------------------------
def _tile_geometry(n, tile_m, tile_k):
    assert tile_m % 128 == 0, "tile_m must be a multiple of 128"
    tile_k = _round_up(max(tile_k, tile_m), tile_m)   # tk multiple of tm (and 128)
    n128 = _round_up(n, 128)
    if n128 <= tile_m:                                # tiny graph: single tile
        return n128, n128, n128
    n_pad = _round_up(n, tile_m)
    if n_pad <= tile_k:                               # single K tile
        return n_pad, tile_m, n_pad
    n_pad = _round_up(n_pad, tile_k)
    return n_pad, tile_m, tile_k


def _vmem_limit_bytes(tm, tk, c_hid_p, c2_p, cbytes):
    c_max = max(c_hid_p, c2_p)
    est = (3 * tm * tk * cbytes          # A tile, multi-buffered
           + 3 * tk * c_max * cbytes     # streamed operand tile
           + 3 * tm * c2_p * 4           # output tile
           + tm * c_max * 4              # f32 accumulator scratch
           + 3 * c_hid_p * c2_p * cbytes # resident fused head weights
           + (4 << 20))                  # compiler scratch headroom
    return int(max(16 << 20, min(_round_up(est, 1 << 20), 40 << 20)))


# ---------------------------------------------------------------------------
# Wrapper: builds raw (A+I) + dinv, precomputes X@W1, runs the two tiled calls.
# ---------------------------------------------------------------------------
def gcn_encoder_forward(x, edge_index, w1, b1, w2, b2, w3, b3,
                        *, tile_m=512, tile_k=1024, use_bf16=True):
    n = x.shape[0]
    _, c_hid = w1.shape
    c_out = w2.shape[1]
    c2 = 2 * c_out

    n_pad, tm, tk = _tile_geometry(n, tile_m, tile_k)
    c_hid_p = _round_up(c_hid, 128)   # NOTE: pad to 256 on v6e/v7x if dims grow
    c2_p = _round_up(c2, 128)
    cdt = jnp.bfloat16 if use_bf16 else jnp.float32
    cbytes = 2 if use_bf16 else 4

    # -- graph operands: raw (A + I), built directly padded & in compute dtype
    #    (values are small exact integers -> lossless in bf16); dinv stays f32.
    src, dst = edge_index[0], edge_index[1]
    a_raw = jnp.zeros((n_pad, n_pad), cdt)
    a_raw = a_raw.at[dst, src].add(jnp.ones(src.shape, cdt))
    diag = jnp.arange(n)
    a_raw = a_raw.at[diag, diag].add(jnp.ones((n,), cdt))        # self loops
    deg = jnp.zeros((n,), jnp.float32).at[dst].add(1.0) + 1.0    # incl. self loop
    dinv = jax.lax.rsqrt(deg)
    dinv_p = jnp.zeros((n_pad, 1), jnp.float32).at[:n, 0].set(dinv)

    # -- small dense precomputes (plain XLA): X@W1 with column-side D^{-1/2}
    xw1 = x.astype(jnp.float32) @ w1.astype(jnp.float32)         # (n, c_hid)
    xw1 = dinv[:, None] * xw1
    xw1_p = jnp.zeros((n_pad, c_hid_p), cdt).at[:n, :c_hid].set(xw1.astype(cdt))
    b1_p = jnp.zeros((1, c_hid_p), jnp.float32).at[:, :c_hid].set(
        jnp.reshape(b1, (1, -1)).astype(jnp.float32))

    w23 = jnp.concatenate([w2, w3], axis=1)                      # (c_hid, 2*c_out)
    b23 = jnp.concatenate([jnp.reshape(b2, (1, -1)),
                           jnp.reshape(b3, (1, -1))], axis=1)
    w23_p = jnp.zeros((c_hid_p, c2_p), cdt).at[:c_hid, :c2].set(w23.astype(cdt))
    b23_p = jnp.zeros((1, c2_p), jnp.float32).at[:, :c2].set(b23.astype(jnp.float32))

    grid = (n_pad // tm, n_pad // tk)
    cparams = pltpu.CompilerParams(
        dimension_semantics=("parallel", "arbitrary"),
        vmem_limit_bytes=_vmem_limit_bytes(tm, tk, c_hid_p, c2_p, cbytes),
    )
    # TODO(synk): pipeline_mode=pl.Buffered(3) on the A spec is a further small
    # DMA-jitter win; omitted for portability across jax versions.

    a_spec = pl.BlockSpec((tm, tk), lambda i, k: (i, k))
    dinv_spec = pl.BlockSpec((tm, 1), lambda i, k: (i, 0))

    cost1 = pl.CostEstimate(
        flops=2 * n_pad * n_pad * c_hid_p + 2 * n_pad * c_hid_p * c2_p,
        transcendentals=0,
        bytes_accessed=(n_pad * n_pad * cbytes
                        + (n_pad // tm) * n_pad * c_hid_p * cbytes
                        + n_pad * c2_p * cbytes))

    # Phase 1: HW' = dinv * relu(dinv * ((A+I) @ dinv*XW1) + b1) @ [W2|W3]
    hw = pl.pallas_call(
        gcn_layer1_kernel,
        out_shape=jax.ShapeDtypeStruct((n_pad, c2_p), cdt),
        grid_spec=pltpu.PrefetchScalarGridSpec(
            num_scalar_prefetch=0,
            grid=grid,
            in_specs=[
                a_spec,                                             # (A+I) tile
                pl.BlockSpec((tk, c_hid_p), lambda i, k: (k, 0)),   # dinv*X@W1
                dinv_spec,
                pl.BlockSpec((1, c_hid_p), lambda i, k: (0, 0)),    # b1
                pl.BlockSpec((c_hid_p, c2_p), lambda i, k: (0, 0)), # W2||W3
            ],
            out_specs=pl.BlockSpec((tm, c2_p), lambda i, k: (i, 0)),
            scratch_shapes=[pltpu.VMEM((tm, c_hid_p), jnp.float32)],
        ),
        compiler_params=cparams,
        cost_estimate=cost1,
    )(a_raw, xw1_p, dinv_p, b1_p, w23_p)

    cost2 = pl.CostEstimate(
        flops=2 * n_pad * n_pad * c2_p,
        transcendentals=0,
        bytes_accessed=(n_pad * n_pad * cbytes
                        + (n_pad // tm) * n_pad * c2_p * cbytes
                        + n_pad * c2_p * 4))

    # Phase 2: OUT = dinv * ((A+I) @ HW') + [b2|b3]   (OUT = [mu | logvar])
    out = pl.pallas_call(
        gcn_layer2_kernel,
        out_shape=jax.ShapeDtypeStruct((n_pad, c2_p), jnp.float32),
        grid_spec=pltpu.PrefetchScalarGridSpec(
            num_scalar_prefetch=0,
            grid=grid,
            in_specs=[
                a_spec,                                             # (A+I) tile
                pl.BlockSpec((tk, c2_p), lambda i, k: (k, 0)),      # HW'
                dinv_spec,
                pl.BlockSpec((1, c2_p), lambda i, k: (0, 0)),       # b2||b3
            ],
            out_specs=pl.BlockSpec((tm, c2_p), lambda i, k: (i, 0)),
            scratch_shapes=[pltpu.VMEM((tm, c2_p), jnp.float32)],
        ),
        compiler_params=cparams,
        cost_estimate=cost2,
    )(a_raw, hw, dinv_p, b23_p)

    mu = out[:n, :c_out]
    logvar = out[:n, c_out:c2]
    return mu, logvar


# ---------------------------------------------------------------------------
# Pure-JAX reference (same math, no Pallas)
# ---------------------------------------------------------------------------
def normalized_adjacency_ref(edge_index, num_nodes):
    src, dst = edge_index[0], edge_index[1]
    a = jnp.zeros((num_nodes, num_nodes), jnp.float32)
    a = a.at[dst, src].add(1.0)
    a = a + jnp.eye(num_nodes, dtype=jnp.float32)
    deg = a.sum(axis=1)
    dinv = jnp.where(deg > 0, 1.0 / jnp.sqrt(deg), 0.0)
    return dinv[:, None] * a * dinv[None, :]


def gcn_encoder_ref(x, edge_index, w1, b1, w2, b2, w3, b3):
    a_hat = normalized_adjacency_ref(edge_index, x.shape[0])
    h = jnp.maximum(a_hat @ (x @ w1) + b1, 0.0)
    mu = a_hat @ (h @ w2) + b2
    logvar = a_hat @ (h @ w3) + b3
    return mu, logvar


if __name__ == "__main__":
    # Small deterministic shapes: 16 nodes, in=8, hidden=32, out=16
    N, C_IN, C_HID, C_OUT = 16, 8, 32, 16

    key = jax.random.PRNGKey(0)
    k_x, k_w1, k_w2, k_w3 = jax.random.split(key, 4)

    x = jax.random.normal(k_x, (N, C_IN), dtype=jnp.float32)

    # deterministic undirected ring graph as edge_index (2, E)
    idx = jnp.arange(N)
    src = jnp.concatenate([idx, (idx + 1) % N])
    dst = jnp.concatenate([(idx + 1) % N, idx])
    edge_index = jnp.stack([src, dst], axis=0)

    def glorot(k, shape):
        fan_in, fan_out = shape
        s = jnp.sqrt(6.0 / (fan_in + fan_out))
        return jax.random.uniform(k, shape, jnp.float32, -s, s)

    w1 = glorot(k_w1, (C_IN, C_HID))
    b1 = jnp.zeros((1, C_HID), jnp.float32)
    w2 = glorot(k_w2, (C_HID, C_OUT))
    b2 = jnp.zeros((1, C_OUT), jnp.float32)
    w3 = glorot(k_w3, (C_HID, C_OUT))
    b3 = jnp.zeros((1, C_OUT), jnp.float32)

    run_f32 = jax.jit(functools.partial(gcn_encoder_forward, use_bf16=False))
    run_bf16 = jax.jit(functools.partial(gcn_encoder_forward, use_bf16=True))

    mu_ref, logvar_ref = gcn_encoder_ref(x, edge_index, w1, b1, w2, b2, w3, b3)

    # Exact (f32-operand) path: tight check of the kernel structure.
    mu_f32, lv_f32 = run_f32(x, edge_index, w1, b1, w2, b2, w3, b3)
    jax.block_until_ready((mu_f32, lv_f32))
    assert mu_f32.shape == (N, C_OUT) and lv_f32.shape == (N, C_OUT)
    assert jnp.allclose(mu_f32, mu_ref, atol=1e-4, rtol=1e-4)
    assert jnp.allclose(lv_f32, logvar_ref, atol=1e-4, rtol=1e-4)

    # Default fast path: bf16 matmul operands, f32 accumulation & normalization.
    mu, logvar = run_bf16(x, edge_index, w1, b1, w2, b2, w3, b3)
    jax.block_until_ready((mu, logvar))
    assert mu.shape == (N, C_OUT) and logvar.shape == (N, C_OUT)
    assert jnp.allclose(mu, mu_ref, atol=5e-2, rtol=5e-2)
    assert jnp.allclose(logvar, logvar_ref, atol=5e-2, rtol=5e-2)

    print("KERNEL_OK")
</pallas_src>

<mosaic_0001>
module attributes {stable_mosaic.version = 11 : i64} {
  func.func @gcn_layer1_kernel(%arg0: i32, %arg1: i32, %arg2: memref<128x128xf32, #tpu.memory_space<vmem>>, %arg3: memref<128x128xf32, #tpu.memory_space<vmem>>, %arg4: memref<128x1xf32, #tpu.memory_space<vmem>>, %arg5: memref<1x128xf32, #tpu.memory_space<vmem>>, %arg6: memref<128x128xf32, #tpu.memory_space<vmem>>, %arg7: memref<128x128xf32, #tpu.memory_space<vmem>>, %arg8: memref<128x128xf32, #tpu.memory_space<vmem>>) attributes {dimension_semantics = [#tpu.dimension_semantics<parallel>, #tpu.dimension_semantics<arbitrary>], iteration_bounds = array<i64: 1, 1>, scalar_prefetch = 0 : i64, scratch_operands = 1 : i64, tpu.core_type = #tpu.core_type<tc>, window_params = [{transform_indices = @transform_0, window_bounds = array<i64: 128, 128>}, {transform_indices = @transform_1, window_bounds = array<i64: 128, 128>}, {transform_indices = @transform_2, window_bounds = array<i64: 128, 1>}, {pipeline_mode = #tpu.pipeline_mode<synchronous>, transform_indices = @transform_3, window_bounds = array<i64: 1, 128>}, {pipeline_mode = #tpu.pipeline_mode<synchronous>, transform_indices = @transform_4, window_bounds = array<i64: 128, 128>}, {transform_indices = @transform_5, window_bounds = array<i64: 128, 128>}]} {
    %c0_i32 = arith.constant 0 : i32
    %0 = arith.cmpi eq, %arg1, %c0_i32 : i32
    %1 = arith.extui %0 : i1 to i32
    %c0_i32_0 = arith.constant 0 : i32
    %2 = arith.cmpi ne, %1, %c0_i32_0 : i32
    scf.if %2 {
      %cst_10 = arith.constant 0.000000e+00 : f32
      %12 = vector.broadcast %cst_10 : f32 to vector<128x128xf32>
      %c0_11 = arith.constant 0 : index
      %c0_12 = arith.constant 0 : index
      %13 = vector.load %arg8[%c0_11, %c0_12] : memref<128x128xf32, #tpu.memory_space<vmem>>, vector<128x128xf32>
      tpu.vector_store %arg8[%c0_11, %c0_12], %12 {strides = array<i32>} : memref<128x128xf32, #tpu.memory_space<vmem>>, vector<128x128xf32>,
    } else {
    }
    %c0 = arith.constant 0 : index
    %c0_1 = arith.constant 0 : index
    %3 = vector.load %arg8[%c0, %c0_1] : memref<128x128xf32, #tpu.memory_space<vmem>>, vector<128x128xf32>
    %c0_2 = arith.constant 0 : index
    %c0_3 = arith.constant 0 : index
    %4 = vector.load %arg2[%c0_2, %c0_3] : memref<128x128xf32, #tpu.memory_space<vmem>>, vector<128x128xf32>
    %c0_4 = arith.constant 0 : index
    %c0_5 = arith.constant 0 : index
    %5 = vector.load %arg3[%c0_4, %c0_5] : memref<128x128xf32, #tpu.memory_space<vmem>>, vector<128x128xf32>
    %cst = arith.constant dense<0.000000e+00> : vector<128x128xf32>
    %6 = tpu.matmul %4, %5, %cst {dimension_numbers = #tpu.dot_dimension_numbers<[1], [0], [0], [1], [0, 0, 1, 1], [], []>} : vector<128x128xf32>, vector<128x128xf32>, vector<128x128xf32> -> vector<128x128xf32>
    %7 = arith.addf %3, %6 : vector<128x128xf32>
    %c0_6 = arith.constant 0 : index
    %c0_7 = arith.constant 0 : index
    %8 = vector.load %arg8[%c0_6, %c0_7] : memref<128x128xf32, #tpu.memory_space<vmem>>, vector<128x128xf32>
    tpu.vector_store %arg8[%c0_6, %c0_7], %7 {strides = array<i32>} : memref<128x128xf32, #tpu.memory_space<vmem>>, vector<128x128xf32>,
    %c0_i32_8 = arith.constant 0 : i32
    %9 = arith.cmpi eq, %arg1, %c0_i32_8 : i32
    %10 = arith.extui %9 : i1 to i32
    %c0_i32_9 = arith.constant 0 : i32
    %11 = arith.cmpi ne, %10, %c0_i32_9 : i32
    scf.if %11 {
      %c0_10 = arith.constant 0 : index
      %c0_11 = arith.constant 0 : index
      %12 = vector.load %arg4[%c0_10, %c0_11] : memref<128x1xf32, #tpu.memory_space<vmem>>, vector<128x1xf32>
      %c0_12 = arith.constant 0 : index
      %c0_13 = arith.constant 0 : index
      %13 = vector.load %arg8[%c0_12, %c0_13] : memref<128x128xf32, #tpu.memory_space<vmem>>, vector<128x128xf32>
      %14 = vector.broadcast %12 : vector<128x1xf32> to vector<128x128xf32>
      %15 = arith.mulf %14, %13 : vector<128x128xf32>
      %c0_14 = arith.constant 0 : index
      %c0_15 = arith.constant 0 : index
      %16 = vector.load %arg5[%c0_14, %c0_15] : memref<1x128xf32, #tpu.memory_space<vmem>>, vector<1x128xf32>
      %17 = vector.broadcast %16 : vector<1x128xf32> to vector<128x128xf32>
      %18 = arith.addf %15, %17 : vector<128x128xf32>
      %cst_16 = arith.constant 0.000000e+00 : f32
      %19 = vector.broadcast %cst_16 : f32 to vector<128x128xf32>
      %20 = arith.maximumf %18, %19 : vector<128x128xf32>
      %c0_17 = arith.constant 0 : index
      %c0_18 = arith.constant 0 : index
      %21 = vector.load %arg6[%c0_17, %c0_18] : memref<128x128xf32, #tpu.memory_space<vmem>>, vector<128x128xf32>
      %cst_19 = arith.constant dense<0.000000e+00> : vector<128x128xf32>
      %22 = tpu.matmul %20, %21, %cst_19 {dimension_numbers = #tpu.dot_dimension_numbers<[1], [0], [0], [1], [0, 0, 1, 1], [], []>} : vector<128x128xf32>, vector<128x128xf32>, vector<128x128xf32> -> vector<128x128xf32>
      %23 = vector.broadcast %12 : vector<128x1xf32> to vector<128x128xf32>
      %24 = arith.mulf %23, %22 : vector<128x128xf32>
      %c0_20 = arith.constant 0 : index
      %c0_21 = arith.constant 0 : index
      %25 = vector.load %arg7[%c0_20, %c0_21] : memref<128x128xf32, #tpu.memory_space<vmem>>, vector<128x128xf32>
      tpu.vector_store %arg7[%c0_20, %c0_21], %24 {strides = array<i32>} : memref<128x128xf32, #tpu.memory_space<vmem>>, vector<128x128xf32>,
    } else {
    }
    return
  }
  func.func @transform_0(%arg0: i32, %arg1: i32) -> (i32, i32) {
    %c0_i32 = arith.constant 0 : i32
    return %arg0, %arg1 : i32, i32
  }
  func.func @transform_1(%arg0: i32, %arg1: i32) -> (i32, i32) {
    %c0_i32 = arith.constant 0 : i32
    %c0_i32_0 = arith.constant 0 : i32
    return %arg1, %c0_i32 : i32, i32
  }
  func.func @transform_2(%arg0: i32, %arg1: i32) -> (i32, i32) {
    %c0_i32 = arith.constant 0 : i32
    %c0_i32_0 = arith.constant 0 : i32
    return %arg0, %c0_i32 : i32, i32
  }
  func.func @transform_3(%arg0: i32, %arg1: i32) -> (i32, i32) {
    %c0_i32 = arith.constant 0 : i32
    %c0_i32_0 = arith.constant 0 : i32
    %c0_i32_1 = arith.constant 0 : i32
    return %c0_i32, %c0_i32_0 : i32, i32
  }
  func.func @transform_4(%arg0: i32, %arg1: i32) -> (i32, i32) {
    %c0_i32 = arith.constant 0 : i32
    %c0_i32_0 = arith.constant 0 : i32
    %c0_i32_1 = arith.constant 0 : i32
    return %c0_i32, %c0_i32_0 : i32, i32
  }
  func.func @transform_5(%arg0: i32, %arg1: i32) -> (i32, i32) {
    %c0_i32 = arith.constant 0 : i32
    %c0_i32_0 = arith.constant 0 : i32
    return %arg0, %c0_i32 : i32, i32
  }
}

module attributes {stable_mosaic.version = 11 : i64} {
  func.func @gcn_layer2_kernel(%arg0: i32, %arg1: i32, %arg2: memref<128x128xf32, #tpu.memory_space<vmem>>, %arg3: memref<128x128xf32, #tpu.memory_space<vmem>>, %arg4: memref<128x1xf32, #tpu.memory_space<vmem>>, %arg5: memref<1x128xf32, #tpu.memory_space<vmem>>, %arg6: memref<128x128xf32, #tpu.memory_space<vmem>>, %arg7: memref<128x128xf32, #tpu.memory_space<vmem>>) attributes {dimension_semantics = [#tpu.dimension_semantics<parallel>, #tpu.dimension_semantics<arbitrary>], iteration_bounds = array<i64: 1, 1>, scalar_prefetch = 0 : i64, scratch_operands = 1 : i64, tpu.core_type = #tpu.core_type<tc>, window_params = [{transform_indices = @transform_0, window_bounds = array<i64: 128, 128>}, {transform_indices = @transform_1, window_bounds = array<i64: 128, 128>}, {transform_indices = @transform_2, window_bounds = array<i64: 128, 1>}, {pipeline_mode = #tpu.pipeline_mode<synchronous>, transform_indices = @transform_3, window_bounds = array<i64: 1, 128>}, {transform_indices = @transform_4, window_bounds = array<i64: 128, 128>}]} {
    %c0_i32 = arith.constant 0 : i32
    %0 = arith.cmpi eq, %arg1, %c0_i32 : i32
    %1 = arith.extui %0 : i1 to i32
    %c0_i32_0 = arith.constant 0 : i32
    %2 = arith.cmpi ne, %1, %c0_i32_0 : i32
    scf.if %2 {
      %cst_10 = arith.constant 0.000000e+00 : f32
      %12 = vector.broadcast %cst_10 : f32 to vector<128x128xf32>
      %c0_11 = arith.constant 0 : index
      %c0_12 = arith.constant 0 : index
      %13 = vector.load %arg7[%c0_11, %c0_12] : memref<128x128xf32, #tpu.memory_space<vmem>>, vector<128x128xf32>
      tpu.vector_store %arg7[%c0_11, %c0_12], %12 {strides = array<i32>} : memref<128x128xf32, #tpu.memory_space<vmem>>, vector<128x128xf32>,
    } else {
    }
    %c0 = arith.constant 0 : index
    %c0_1 = arith.constant 0 : index
    %3 = vector.load %arg7[%c0, %c0_1] : memref<128x128xf32, #tpu.memory_space<vmem>>, vector<128x128xf32>
    %c0_2 = arith.constant 0 : index
    %c0_3 = arith.constant 0 : index
    %4 = vector.load %arg2[%c0_2, %c0_3] : memref<128x128xf32, #tpu.memory_space<vmem>>, vector<128x128xf32>
    %c0_4 = arith.constant 0 : index
    %c0_5 = arith.constant 0 : index
    %5 = vector.load %arg3[%c0_4, %c0_5] : memref<128x128xf32, #tpu.memory_space<vmem>>, vector<128x128xf32>
    %cst = arith.constant dense<0.000000e+00> : vector<128x128xf32>
    %6 = tpu.matmul %4, %5, %cst {dimension_numbers = #tpu.dot_dimension_numbers<[1], [0], [0], [1], [0, 0, 1, 1], [], []>} : vector<128x128xf32>, vector<128x128xf32>, vector<128x128xf32> -> vector<128x128xf32>
    %7 = arith.addf %3, %6 : vector<128x128xf32>
    %c0_6 = arith.constant 0 : index
    %c0_7 = arith.constant 0 : index
    %8 = vector.load %arg7[%c0_6, %c0_7] : memref<128x128xf32, #tpu.memory_space<vmem>>, vector<128x128xf32>
    tpu.vector_store %arg7[%c0_6, %c0_7], %7 {strides = array<i32>} : memref<128x128xf32, #tpu.memory_space<vmem>>, vector<128x128xf32>,
    %c0_i32_8 = arith.constant 0 : i32
    %9 = arith.cmpi eq, %arg1, %c0_i32_8 : i32
    %10 = arith.extui %9 : i1 to i32
    %c0_i32_9 = arith.constant 0 : i32
    %11 = arith.cmpi ne, %10, %c0_i32_9 : i32
    scf.if %11 {
      %c0_10 = arith.constant 0 : index
      %c0_11 = arith.constant 0 : index
      %12 = vector.load %arg4[%c0_10, %c0_11] : memref<128x1xf32, #tpu.memory_space<vmem>>, vector<128x1xf32>
      %c0_12 = arith.constant 0 : index
      %c0_13 = arith.constant 0 : index
      %13 = vector.load %arg7[%c0_12, %c0_13] : memref<128x128xf32, #tpu.memory_space<vmem>>, vector<128x128xf32>
      %14 = vector.broadcast %12 : vector<128x1xf32> to vector<128x128xf32>
      %15 = arith.mulf %14, %13 : vector<128x128xf32>
      %c0_14 = arith.constant 0 : index
      %c0_15 = arith.constant 0 : index
      %16 = vector.load %arg5[%c0_14, %c0_15] : memref<1x128xf32, #tpu.memory_space<vmem>>, vector<1x128xf32>
      %17 = vector.broadcast %16 : vector<1x128xf32> to vector<128x128xf32>
      %18 = arith.addf %15, %17 : vector<128x128xf32>
      %c0_16 = arith.constant 0 : index
      %c0_17 = arith.constant 0 : index
      %19 = vector.load %arg6[%c0_16, %c0_17] : memref<128x128xf32, #tpu.memory_space<vmem>>, vector<128x128xf32>
      tpu.vector_store %arg6[%c0_16, %c0_17], %18 {strides = array<i32>} : memref<128x128xf32, #tpu.memory_space<vmem>>, vector<128x128xf32>,
    } else {
    }
    return
  }
  func.func @transform_0(%arg0: i32, %arg1: i32) -> (i32, i32) {
    %c0_i32 = arith.constant 0 : i32
    return %arg0, %arg1 : i32, i32
  }
  func.func @transform_1(%arg0: i32, %arg1: i32) -> (i32, i32) {
    %c0_i32 = arith.constant 0 : i32
    %c0_i32_0 = arith.constant 0 : i32
    return %arg1, %c0_i32 : i32, i32
  }
  func.func @transform_2(%arg0: i32, %arg1: i32) -> (i32, i32) {
    %c0_i32 = arith.constant 0 : i32
    %c0_i32_0 = arith.constant 0 : i32
    return %arg0, %c0_i32 : i32, i32
  }
  func.func @transform_3(%arg0: i32, %arg1: i32) -> (i32, i32) {
    %c0_i32 = arith.constant 0 : i32
    %c0_i32_0 = arith.constant 0 : i32
    %c0_i32_1 = arith.constant 0 : i32
    return %c0_i32, %c0_i32_0 : i32, i32
  }
  func.func @transform_4(%arg0: i32, %arg1: i32) -> (i32, i32) {
    %c0_i32 = arith.constant 0 : i32
    %c0_i32_0 = arith.constant 0 : i32
    return %arg0, %c0_i32 : i32, i32
  }
}

</mosaic_0001>

<bundles_post_ra>
// kernel: gcn_encoder_forward.2
= control target key start
LH: loop header
LB: loop body
LE: loop exit
PB: predicated region body
PF: predicated region fallthrough
CT: control target
= control target key end

     0   :  { %v506_v2 = vmov 0   ;;  %s850_s1 = inlined_call_operand.vmem [shape: f32[128,128], index: 1, kind: input, shape index: {}]   ;;  %s851_s2 = inlined_call_operand.vmem [shape: f32[128,1], index: 2, kind: input, shape index: {}]   ;;  %s852_s0 = inlined_call_operand.vmem [shape: f32[128,128], index: 0, kind: input, shape index: {}]   ;;  %s853_s3 = inlined_call_operand.vmem [shape: f32[1,128], index: 3, kind: input, shape index: {}]   ;;  %s854_s4 = inlined_call_operand.vmem [shape: f32[128,128], index: 4, kind: input, shape index: {}]   ;;  %s855_s5 = inlined_call_operand.vmem [shape: f32[128,128], index: 5, kind: output, shape index: {}]  }
   0x1   :  { %v87_v0 = vld [vmem:[%s850_s1 + $0x78] sm:$0xff]  ;;  %v86_v1 = vld [vmem:[%s850_s1 + $0x70] sm:$0xff]  ;;  %502 = vset.pattern.permute.xlu0 %v506_v2  ;;  %503 = vset.pattern.permute.xlu1 %v506_v2  ;;  %v196_v3 = vld [vmem:[%s851_s2 + $0x40] sm:$0xff] }
   0x2   :  { %88 = vmatpush.msra.mxu0 %v87_v0  ;;  %469 = vmatpush.msra.mxu2 %v87_v0  ;;  %v85_v4 = vld [vmem:[%s850_s1 + $0x68] sm:$0xff]  ;;  %v84_v5 = vld [vmem:[%s850_s1 + $0x60] sm:$0xff]  ;;  %v83_v7 = vld [vmem:[%s850_s1 + $0x58] sm:$0xff] }
   0x3   :  { %262 = vperm.xlu0 %502, %v196_v3   ;;  %504 = vset.pattern.permute.xlu2 %v506_v2  ;;  %v197_v6 = vld [vmem:[%s851_s2 + $0x48] sm:$0xff]  ;;  %v188_v8 = vld [vmem:[%s851_s2] sm:$0xff]  ;;  %v82_v9 = vld [vmem:[%s850_s1 + $0x50] sm:$0xff] }
   0x4   :  { %89 = vmatpush.msra.mxu0 %v86_v1  ;;  %470 = vmatpush.msra.mxu2 %v86_v1  ;;  %v81_v10 = vld [vmem:[%s850_s1 + $0x48] sm:$0xff]  ;;  %v80_v12 = vld [vmem:[%s850_s1 + $0x40] sm:$0xff]  ;;  %v79_v13 = vld [vmem:[%s850_s1 + $0x38] sm:$0xff] }
   0x5   :  { %267 = vperm.xlu1 %503, %v197_v6   ;;  %v189_v11 = vld [vmem:[%s851_s2 + $0x8] sm:$0xff]  ;;  %v199_v14 = vld [vmem:[%s851_s2 + $0x58] sm:$0xff]  ;;  %v78_v15 = vld [vmem:[%s850_s1 + $0x30] sm:$0xff] }
   0x6   :  { %90 = vmatpush.msra.mxu0 %v85_v4  ;;  %471 = vmatpush.msra.mxu2 %v85_v4  ;;  %v198_v16 = vld [vmem:[%s851_s2 + $0x50] sm:$0xff]  ;;  %v77_v17 = vld [vmem:[%s850_s1 + $0x28] sm:$0xff]  ;;  %v191_v18 = vld [vmem:[%s851_s2 + $0x18] sm:$0xff] }
   0x7   :  { %272 = vperm.xlu2 %504, %v198_v16   ;;  %v76_v19 = vld [vmem:[%s850_s1 + $0x20] sm:$0xff]  ;;  %v75_v20 = vld [vmem:[%s850_s1 + $0x18] sm:$0xff]  ;;  %v74_v22 = vld [vmem:[%s850_s1 + $0x10] sm:$0xff] }
   0x8   :  { %91 = vmatpush.msra.mxu0 %v84_v5  ;;  %472 = vmatpush.msra.mxu2 %v84_v5  ;;  %v192_v21 = vld [vmem:[%s851_s2 + $0x20] sm:$0xff]  ;;  %v190_v23 = vld [vmem:[%s851_s2 + $0x10] sm:$0xff]  ;;  %v73_v24 = vld [vmem:[%s850_s1 + $0x8] sm:$0xff] }
   0x9   :  { %v201_v25 = vld [vmem:[%s851_s2 + $0x68] sm:$0xff]  ;;  %v72_v26 = vld [vmem:[%s850_s1] sm:$0xff]  ;;  %v202_v29 = vld [vmem:[%s851_s2 + $0x70] sm:$0xff] }
   0xa   :  { %92 = vmatpush.msra.mxu0 %v83_v7  ;;  %473 = vmatpush.msra.mxu2 %v83_v7  ;;  %v56_v27 = vld [vmem:[%s852_s0] sm:$0xff]  ;;  %v194_v31 = vld [vmem:[%s851_s2 + $0x30] sm:$0xff]  ;;  %v57_v32 = vld [vmem:[%s852_s0 + $0x8] sm:$0xff] }
   0xb   :  { %222 = vperm.xlu0 %502, %v188_v8   ;;  %v64_v28 = vld [vmem:[%s852_s0 + $0x40] sm:$0xff]  ;;  %v65_v33 = vld [vmem:[%s852_s0 + $0x48] sm:$0xff]  ;;  %v195_v34 = vld [vmem:[%s851_s2 + $0x38] sm:$0xff] }
   0xc   :  { %93 = vmatpush.msra.mxu0 %v82_v9  ;;  %474 = vmatpush.msra.mxu2 %v82_v9  ;;  %v200_v30 = vld [vmem:[%s851_s2 + $0x60] sm:$0xff]  ;;  %v193_v35 = vld [vmem:[%s851_s2 + $0x28] sm:$0xff]  ;;  %v58_v36 = vld [vmem:[%s852_s0 + $0x10] sm:$0xff] }
   0xd   :  { %227 = vperm.xlu1 %503, %v189_v11   ;;  %v66_v37 = vld [vmem:[%s852_s0 + $0x50] sm:$0xff]  ;;  %v203_v38 = vld [vmem:[%s851_s2 + $0x78] sm:$0xff]  ;;  %v60_v41 = vld [vmem:[%s852_s0 + $0x20] sm:$0xff] }
   0xe   :  { %94 = vmatpush.msra.mxu0 %v81_v10  ;;  %475 = vmatpush.msra.mxu2 %v81_v10  ;;  %v59_v39 = vld [vmem:[%s852_s0 + $0x18] sm:$0xff]  ;;  %v68_v42 = vld [vmem:[%s852_s0 + $0x60] sm:$0xff]  ;;  %v61_v43 = vld [vmem:[%s852_s0 + $0x28] sm:$0xff] }
   0xf   :  { %232 = vperm.xlu2 %504, %v190_v23   ;;  %v67_v40 = vld [vmem:[%s852_s0 + $0x58] sm:$0xff]  ;;  %v69_v44 = vld [vmem:[%s852_s0 + $0x68] sm:$0xff]  ;;  %v62_v45 = vld [vmem:[%s852_s0 + $0x30] sm:$0xff] }
  0x10   :  { %95 = vmatpush.msra.mxu0 %v80_v12  ;;  %476 = vmatpush.msra.mxu2 %v80_v12  ;;  %v70_v46 = vld [vmem:[%s852_s0 + $0x70] sm:$0xff]  ;;  %v63_v47 = vld [vmem:[%s852_s0 + $0x38] sm:$0xff]  ;;  %v365_v51 = vld [vmem:[%s854_s4 + $0x68] sm:$0xff] }
  0x11   :  { %v71_v48 = vld [vmem:[%s852_s0 + $0x78] sm:$0xff]  ;;  %v366_v50 = vld [vmem:[%s854_s4 + $0x70] sm:$0xff]  ;;  %v364_v52 = vld [vmem:[%s854_s4 + $0x60] sm:$0xff] }
  0x12   :  { %96 = vmatpush.msra.mxu0 %v79_v13  ;;  %477 = vmatpush.msra.mxu2 %v79_v13  ;;  %v367_v49 = vld [vmem:[%s854_s4 + $0x78] sm:$0xff]  ;;  %v362_v54 = vld [vmem:[%s854_s4 + $0x50] sm:$0xff]  ;;  %v361_v55 = vld [vmem:[%s854_s4 + $0x48] sm:$0xff] }
  0x13   :  { %277 = vperm.xlu0 %502, %v199_v14   ;;  %368 = vmatpush.msra.mxu1 %v367_v49  ;;  %v363_v53 = vld [vmem:[%s854_s4 + $0x58] sm:$0xff]  ;;  %v360_v56 = vld [vmem:[%s854_s4 + $0x40] sm:$0xff]  ;;  %v358_v58 = vld [vmem:[%s854_s4 + $0x30] sm:$0xff] }
  0x14   :  { %97 = vmatpush.msra.mxu0 %v78_v15  ;;  %478 = vmatpush.msra.mxu2 %v78_v15  ;;  %v359_v57 = vld [vmem:[%s854_s4 + $0x38] sm:$0xff]  ;;  %v357_v59 = vld [vmem:[%s854_s4 + $0x28] sm:$0xff]  ;;  %v356_v60 = vld [vmem:[%s854_s4 + $0x20] sm:$0xff] }
  0x15   :  { %237 = vperm.xlu1 %503, %v191_v18   ;;  %485 = vmatpush.msra.mxu3 %v367_v49  ;;  %v355_v61 = vld [vmem:[%s854_s4 + $0x18] sm:$0xff]  ;;  %v354_v62 = vld [vmem:[%s854_s4 + $0x10] sm:$0xff]  ;;  %v353_v63 = vld [vmem:[%s854_s4 + $0x8] sm:$0xff] }
  0x16   :  { %98 = vmatpush.msra.mxu0 %v77_v17  ;;  %479 = vmatpush.msra.mxu2 %v77_v17  ;;  %v352_v0 = vld [vmem:[%s854_s4] sm:$0xff] }
  0x17   :  { %282 = vperm.xlu2 %504, %v200_v30   ;;  %369 = vmatpush.msra.mxu1 %v366_v50  ;;  %v736_v3 = vld [vmem:[%s853_s3] ss:$0 sm:$0xff] }
  0x18   :  { %99 = vmatpush.msra.mxu0 %v76_v19  ;;  %480 = vmatpush.msra.mxu2 %v76_v19 }
  0x19   :  { %486 = vmatpush.msra.mxu3 %v366_v50  ;;  %370 = vmatpush.msra.mxu1 %v365_v51 }
  0x1a   :  { %100 = vmatpush.msra.mxu0 %v75_v20  ;;  %481 = vmatpush.msra.mxu2 %v75_v20 }
  0x1b   :  { %242 = vperm.xlu0 %502, %v192_v21   ;;  %487 = vmatpush.msra.mxu3 %v365_v51 }
  0x1c   :  { %101 = vmatpush.msra.mxu0 %v74_v22  ;;  %482 = vmatpush.msra.mxu2 %v74_v22 }
  0x1d   :  { %287 = vperm.xlu1 %503, %v201_v25   ;;  %371 = vmatpush.msra.mxu1 %v364_v52 }
  0x1e   :  { %102 = vmatpush.msra.mxu0 %v73_v24  ;;  %483 = vmatpush.msra.mxu2 %v73_v24 }
  0x1f   :  { %247 = vperm.xlu2 %504, %v193_v35   ;;  %488 = vmatpush.msra.mxu3 %v364_v52 }
  0x20   :  { %103 = vmatpush.msra.mxu0 %v72_v26  ;;  %484 = vmatpush.msra.mxu2 %v72_v26 }
  0x21   :  { %104 = vmatmul.f32.vlgmr.msra.gmra.mxu0 %v56_v27  ;;  %128 = vmatmul.f32.vlgmr.msra.gmra.mxu2 %v64_v28 }
  0x22   :  { %372 = vmatpush.msra.mxu1 %v363_v53  ;;  %489 = vmatpush.msra.mxu3 %v363_v53 }
  0x23   :  { %292 = vperm.xlu0 %502, %v202_v29  }
  0x24   :  { %373 = vmatpush.msra.mxu1 %v362_v54  ;;  %490 = vmatpush.msra.mxu3 %v362_v54 }
  0x25   :  { %252 = vperm.xlu1 %503, %v194_v31  }
  0x26   :  { %374 = vmatpush.msra.mxu1 %v361_v55  ;;  %491 = vmatpush.msra.mxu3 %v361_v55 }
  0x27   :  { %297 = vperm.xlu2 %504, %v203_v38  }
  0x28   :  { %375 = vmatpush.msra.mxu1 %v360_v56  ;;  %492 = vmatpush.msra.mxu3 %v360_v56 }
  0x29   :  { %107 = vmatmul.f32.gmra.mxu0 %v57_v32  ;;  %131 = vmatmul.f32.gmra.mxu2 %v65_v33 }
  0x2a   :  { %376 = vmatpush.msra.mxu1 %v359_v57  ;;  %493 = vmatpush.msra.mxu3 %v359_v57 }
  0x2b   :  { %257 = vperm.xlu0 %502, %v195_v34  }
  0x2c   :  { %377 = vmatpush.msra.mxu1 %v358_v58  ;;  %494 = vmatpush.msra.mxu3 %v358_v58 }
  0x2e   :  { %378 = vmatpush.msra.mxu1 %v357_v59  ;;  %495 = vmatpush.msra.mxu3 %v357_v59 }
  0x30   :  { %379 = vmatpush.msra.mxu1 %v356_v60  ;;  %496 = vmatpush.msra.mxu3 %v356_v60 }
  0x31   :  { %110 = vmatmul.f32.gmra.mxu0 %v58_v36  ;;  %134 = vmatmul.f32.gmra.mxu2 %v66_v37 }
  0x32   :  { %380 = vmatpush.msra.mxu1 %v355_v61  ;;  %497 = vmatpush.msra.mxu3 %v355_v61 }
  0x34   :  { %381 = vmatpush.msra.mxu1 %v354_v62  ;;  %498 = vmatpush.msra.mxu3 %v354_v62 }
  0x36   :  { %382 = vmatpush.msra.mxu1 %v353_v63  ;;  %499 = vmatpush.msra.mxu3 %v353_v63 }
  0x38   :  { %383 = vmatpush.msra.mxu1 %v352_v0  ;;  %500 = vmatpush.msra.mxu3 %v352_v0 }
  0x39   :  { %113 = vmatmul.f32.gmra.mxu0 %v59_v39  ;;  %137 = vmatmul.f32.gmra.mxu2 %v67_v40 }
  0x41   :  { %116 = vmatmul.f32.gmra.mxu0 %v60_v41  ;;  %140 = vmatmul.f32.gmra.mxu2 %v68_v42 }
  0x49   :  { %119 = vmatmul.f32.gmra.mxu0 %v61_v43  ;;  %143 = vmatmul.f32.gmra.mxu2 %v69_v44 }
  0x51   :  { %122 = vmatmul.f32.gmra.mxu0 %v62_v45  ;;  %146 = vmatmul.f32.gmra.mxu2 %v70_v46 }
  0x59   :  { %125 = vmatmul.f32.gmra.mxu0 %v63_v47  ;;  %149 = vmatmul.f32.gmra.mxu2 %v71_v48 }
  0x61   :  { %v742_v9 = vpop.permute.xlu2 %272 }
  0x69   :  { %v751_v21 = vpop.permute.xlu2 %232 }
  0x71   :  { %v764_v38 = vpop.permute.xlu2 %282 }
  0x75   :  { %v729_v1 = vpop.permute.xlu0 %262 }
  0x77   :  { %v731_v2 = vpop.permute.xlu1 %267 }
  0x79   :  { %v775_v51 = vpop.permute.xlu2 %247 }
  0x7d   :  { %v738_v4 = vpop.permute.xlu0 %222 }
  0x7f   :  { %v745_v12 = vpop.permute.xlu1 %227 }
  0x85   :  { %v756_v28 = vpop.permute.xlu0 %277 }
  0x87   :  { %v759_v31 = vpop.permute.xlu1 %237 }
  0x8d   :  { %v767_v41 = vpop.permute.xlu0 %242 }
  0x8f   :  { %v772_v48 = vpop.permute.xlu1 %287 }
  0x95   :  { %v780_v58 = vpop.permute.xlu0 %292 }
  0x97   :  { %v253_v61 = vpop.permute.xlu1 %252 }
  0x9e   :  { %v105_v5 = vpop.f32.mrf.mxu0 }
  0x9f   :  { %v300_v6 = vmul.f32 %v738_v4, %v105_v5 }
  0xa1   :  { %v320_v7 = vadd.f32 %v736_v3, %v300_v6 }
  0xa3   :  { %v336_v8 = vmax.f32 %v320_v7, 0.0 }
  0xa4   :  { %v129_v10 = vpop.f32.mrf.mxu2 }
  0xa5   :  { %v308_v11 = vmul.f32 %v729_v1, %v129_v10  ;;  %384 = vmatmul.f32.vlgmr.msra.gmra.mxu1 %v336_v8 }
  0xa6   :  { %v108_v13 = vpop.f32.mrf.mxu0 }
  0xa7   :  { %v301_v14 = vmul.f32 %v745_v12, %v108_v13  ;;  %v328_v15 = vadd.f32 %v736_v3, %v308_v11  ;;  %v258_v11 = vpop.permute.xlu0 %257 }
  0xa9   :  { %v344_v16 = vmax.f32 %v328_v15, 0.0  ;;  %v321_v17 = vadd.f32 %v736_v3, %v301_v14 }
  0xab   :  { %408 = vmatmul.f32.vlgmr.msra.gmra.mxu3 %v344_v16  ;;  %v337_v18 = vmax.f32 %v321_v17, 0.0 }
  0xac   :  { %v132_v19 = vpop.f32.mrf.mxu2 }
  0xad   :  { %v309_v20 = vmul.f32 %v731_v2, %v132_v19  ;;  %387 = vmatmul.f32.gmra.mxu1 %v337_v18  ;;  %v298_v19 = vpop.permute.xlu2 %297 }
  0xae   :  { %v111_v22 = vpop.f32.mrf.mxu0 }
  0xaf   :  { %v302_v23 = vmul.f32 %v751_v21, %v111_v22  ;;  %v329_v24 = vadd.f32 %v736_v3, %v309_v20 }
  0xb1   :  { %v345_v25 = vmax.f32 %v329_v24, 0.0  ;;  %v322_v26 = vadd.f32 %v736_v3, %v302_v23 }
  0xb3   :  { %411 = vmatmul.f32.gmra.mxu3 %v345_v25  ;;  %v338_v27 = vmax.f32 %v322_v26, 0.0 }
  0xb4   :  { %v135_v29 = vpop.f32.mrf.mxu2 }
  0xb5   :  { %v310_v30 = vmul.f32 %v742_v9, %v135_v29  ;;  %390 = vmatmul.f32.gmra.mxu1 %v338_v27 }
  0xb6   :  { %v114_v32 = vpop.f32.mrf.mxu0 }
  0xb7   :  { %v303_v33 = vmul.f32 %v759_v31, %v114_v32  ;;  %v330_v34 = vadd.f32 %v736_v3, %v310_v30 }
  0xb9   :  { %v346_v35 = vmax.f32 %v330_v34, 0.0  ;;  %v323_v36 = vadd.f32 %v736_v3, %v303_v33 }
  0xbb   :  { %414 = vmatmul.f32.gmra.mxu3 %v346_v35  ;;  %v339_v37 = vmax.f32 %v323_v36, 0.0 }
  0xbc   :  { %v138_v39 = vpop.f32.mrf.mxu2 }
  0xbd   :  { %v311_v40 = vmul.f32 %v756_v28, %v138_v39  ;;  %393 = vmatmul.f32.gmra.mxu1 %v339_v37 }
  0xbe   :  { %v117_v42 = vpop.f32.mrf.mxu0 }
  0xbf   :  { %v304_v43 = vmul.f32 %v767_v41, %v117_v42  ;;  %v331_v44 = vadd.f32 %v736_v3, %v311_v40 }
  0xc1   :  { %v347_v45 = vmax.f32 %v331_v44, 0.0  ;;  %v324_v46 = vadd.f32 %v736_v3, %v304_v43 }
  0xc3   :  { %417 = vmatmul.f32.gmra.mxu3 %v347_v45  ;;  %v340_v47 = vmax.f32 %v324_v46, 0.0 }
  0xc4   :  { %v141_v49 = vpop.f32.mrf.mxu2 }
  0xc5   :  { %v312_v50 = vmul.f32 %v764_v38, %v141_v49  ;;  %396 = vmatmul.f32.gmra.mxu1 %v340_v47 }
  0xc6   :  { %v120_v52 = vpop.f32.mrf.mxu0 }
  0xc7   :  { %v305_v53 = vmul.f32 %v775_v51, %v120_v52  ;;  %v332_v54 = vadd.f32 %v736_v3, %v312_v50 }
  0xc9   :  { %v348_v55 = vmax.f32 %v332_v54, 0.0  ;;  %v325_v56 = vadd.f32 %v736_v3, %v305_v53 }
  0xcb   :  { %420 = vmatmul.f32.gmra.mxu3 %v348_v55  ;;  %v341_v57 = vmax.f32 %v325_v56, 0.0 }
  0xcc   :  { %v144_v59 = vpop.f32.mrf.mxu2 }
  0xcd   :  { %v313_v60 = vmul.f32 %v772_v48, %v144_v59  ;;  %399 = vmatmul.f32.gmra.mxu1 %v341_v57 }
  0xce   :  { %v123_v62 = vpop.f32.mrf.mxu0 }
  0xcf   :  { %v306_v63 = vmul.f32 %v253_v61, %v123_v62  ;;  %v333_v0 = vadd.f32 %v736_v3, %v313_v60 }
  0xd1   :  { %v349_v5 = vmax.f32 %v333_v0, 0.0  ;;  %v326_v6 = vadd.f32 %v736_v3, %v306_v63 }
  0xd3   :  { %423 = vmatmul.f32.gmra.mxu3 %v349_v5  ;;  %v342_v7 = vmax.f32 %v326_v6, 0.0 }
  0xd4   :  { %v147_v8 = vpop.f32.mrf.mxu2 }
  0xd5   :  { %v314_v10 = vmul.f32 %v780_v58, %v147_v8  ;;  %402 = vmatmul.f32.gmra.mxu1 %v342_v7 }
  0xd6   :  { %v126_v13 = vpop.f32.mrf.mxu0 }
  0xd7   :  { %v307_v14 = vmul.f32 %v258_v11, %v126_v13  ;;  %v334_v15 = vadd.f32 %v736_v3, %v314_v10 }
  0xd9   :  { %v350_v16 = vmax.f32 %v334_v15, 0.0  ;;  %v327_v17 = vadd.f32 %v736_v3, %v307_v14 }
  0xdb   :  { %426 = vmatmul.f32.gmra.mxu3 %v350_v16  ;;  %v343_v18 = vmax.f32 %v327_v17, 0.0 }
  0xdc   :  { %v150_v20 = vpop.f32.mrf.mxu2 }
  0xdd   :  { %v315_v22 = vmul.f32 %v298_v19, %v150_v20  ;;  %405 = vmatmul.f32.gmra.mxu1 %v343_v18 }
  0xdf   :  { %v335_v23 = vadd.f32 %v736_v3, %v315_v22 }
  0xe1   :  { %v351_v24 = vmax.f32 %v335_v23, 0.0 }
  0xe3   :  { %429 = vmatmul.f32.gmra.mxu3 %v351_v24 }
 0x122   :  { %v385_v25 = vpop.f32.mrf.mxu1 }
 0x123   :  { %v433_v26 = vmul.f32 %v385_v25, %v738_v4 }
 0x125   :  { %449 = vst [vmem:[%s855_s5] sm:$0xff] %v433_v26 }
 0x12a   :  { %v388_v27 = vpop.f32.mrf.mxu1 }
 0x12b   :  { %v434_v29 = vmul.f32 %v388_v27, %v745_v12 }
 0x12d   :  { %450 = vst [vmem:[%s855_s5 + $0x8] sm:$0xff] %v434_v29 }
 0x12e   :  { %v409_v30 = vpop.f32.mrf.mxu3 }
 0x12f   :  { %v441_v32 = vmul.f32 %v409_v30, %v729_v1 }
 0x131   :  { %457 = vst [vmem:[%s855_s5 + $0x40] sm:$0xff] %v441_v32 }
 0x132   :  { %v391_v3 = vpop.f32.mrf.mxu1 }
 0x133   :  { %v435_v4 = vmul.f32 %v391_v3, %v751_v21 }
 0x135   :  { %451 = vst [vmem:[%s855_s5 + $0x10] sm:$0xff] %v435_v4 }
 0x136   :  { %v412_v33 = vpop.f32.mrf.mxu3 }
 0x137   :  { %v442_v12 = vmul.f32 %v412_v33, %v731_v2 }
 0x139   :  { %458 = vst [vmem:[%s855_s5 + $0x48] sm:$0xff] %v442_v12 }
 0x13a   :  { %v394_v34 = vpop.f32.mrf.mxu1 }
 0x13b   :  { %v436_v1 = vmul.f32 %v394_v34, %v759_v31 }
 0x13d   :  { %452 = vst [vmem:[%s855_s5 + $0x18] sm:$0xff] %v436_v1 }
 0x13e   :  { %v415_v35 = vpop.f32.mrf.mxu3 }
 0x13f   :  { %v443_v21 = vmul.f32 %v415_v35, %v742_v9 }
 0x141   :  { %459 = vst [vmem:[%s855_s5 + $0x50] sm:$0xff] %v443_v21 }
 0x142   :  { %v397_v36 = vpop.f32.mrf.mxu1 }
 0x143   :  { %v437_v2 = vmul.f32 %v397_v36, %v767_v41 }
 0x145   :  { %453 = vst [vmem:[%s855_s5 + $0x20] sm:$0xff] %v437_v2 }
 0x146   :  { %v418_v37 = vpop.f32.mrf.mxu3 }
 0x147   :  { %v444_v31 = vmul.f32 %v418_v37, %v756_v28 }
 0x149   :  { %460 = vst [vmem:[%s855_s5 + $0x58] sm:$0xff] %v444_v31 }
 0x14a   :  { %v400_v39 = vpop.f32.mrf.mxu1 }
 0x14b   :  { %v438_v9 = vmul.f32 %v400_v39, %v775_v51 }
 0x14d   :  { %454 = vst [vmem:[%s855_s5 + $0x28] sm:$0xff] %v438_v9 }
 0x14e   :  { %v421_v40 = vpop.f32.mrf.mxu3 }
 0x14f   :  { %v445_v41 = vmul.f32 %v421_v40, %v764_v38 }
 0x151   :  { %461 = vst [vmem:[%s855_s5 + $0x60] sm:$0xff] %v445_v41 }
 0x152   :  { %v403_v42 = vpop.f32.mrf.mxu1 }
 0x153   :  { %v439_v28 = vmul.f32 %v403_v42, %v253_v61 }
 0x155   :  { %455 = vst [vmem:[%s855_s5 + $0x30] sm:$0xff] %v439_v28 }
 0x156   :  { %v424_v43 = vpop.f32.mrf.mxu3 }
 0x157   :  { %v446_v44 = vmul.f32 %v424_v43, %v772_v48 }
 0x159   :  { %462 = vst [vmem:[%s855_s5 + $0x68] sm:$0xff] %v446_v44 }
 0x15a   :  { %v406_v45 = vpop.f32.mrf.mxu1 }
 0x15b   :  { %v440_v46 = vmul.f32 %v406_v45, %v258_v11 }
 0x15d   :  { %456 = vst [vmem:[%s855_s5 + $0x38] sm:$0xff] %v440_v46 }
 0x15e   :  { %v427_v38 = vpop.f32.mrf.mxu3 }
 0x15f   :  { %v447_v47 = vmul.f32 %v427_v38, %v780_v58 }
 0x161   :  { %463 = vst [vmem:[%s855_s5 + $0x70] sm:$0xff] %v447_v47 }
 0x166   :  { %v430_v49 = vpop.f32.mrf.mxu3 }
 0x167   :  { %v448_v50 = vmul.f32 %v430_v49, %v298_v19 }
 0x169   :  { %464 = vst [vmem:[%s855_s5 + $0x78] sm:$0xff] %v448_v50 }

// kernel: gcn_encoder_forward.3
= control target key start
LH: loop header
LB: loop body
LE: loop exit
PB: predicated region body
PF: predicated region fallthrough
CT: control target
= control target key end

     0   :  { %v406_v0 = vmov 0   ;;  %s648_s2 = inlined_call_operand.vmem [shape: f32[128,1], index: 2, kind: input, shape index: {}]   ;;  %s649_s1 = inlined_call_operand.vmem [shape: f32[128,128], index: 1, kind: input, shape index: {}]   ;;  %s650_s0 = inlined_call_operand.vmem [shape: f32[128,128], index: 0, kind: input, shape index: {}]   ;;  %s651_s3 = inlined_call_operand.vmem [shape: f32[1,128], index: 3, kind: input, shape index: {}]   ;;  %s652_s4 = inlined_call_operand.vmem [shape: f32[128,128], index: 4, kind: output, shape index: {}]  }
   0x1   :  { %402 = vset.pattern.permute.xlu0 %v406_v0  ;;  %v185_v1 = vld [vmem:[%s648_s2] sm:$0xff]  ;;  %v84_v2 = vld [vmem:[%s649_s1 + $0x78] sm:$0xff]  ;;  %v83_v3 = vld [vmem:[%s649_s1 + $0x70] sm:$0xff]  ;;  %403 = vset.pattern.permute.xlu1 %v406_v0 }
   0x2   :  { %219 = vperm.xlu0 %402, %v185_v1   ;;  %85 = vmatpush.msra.mxu0 %v84_v2  ;;  %v82_v4 = vld [vmem:[%s649_s1 + $0x68] sm:$0xff]  ;;  %v81_v5 = vld [vmem:[%s649_s1 + $0x60] sm:$0xff]  ;;  %v187_v6 = vld [vmem:[%s648_s2 + $0x10] sm:$0xff] }
   0x3   :  { %353 = vmatpush.msra.mxu1 %v84_v2  ;;  %354 = vmatpush.msra.mxu2 %v84_v2  ;;  %v186_v7 = vld [vmem:[%s648_s2 + $0x8] sm:$0xff]  ;;  %v80_v8 = vld [vmem:[%s649_s1 + $0x58] sm:$0xff]  ;;  %v79_v9 = vld [vmem:[%s649_s1 + $0x50] sm:$0xff] }
   0x4   :  { %355 = vmatpush.msra.mxu3 %v84_v2  ;;  %86 = vmatpush.msra.mxu0 %v83_v3  ;;  %v78_v10 = vld [vmem:[%s649_s1 + $0x48] sm:$0xff]  ;;  %v77_v11 = vld [vmem:[%s649_s1 + $0x40] sm:$0xff]  ;;  %v188_v12 = vld [vmem:[%s648_s2 + $0x18] sm:$0xff] }
   0x5   :  { %356 = vmatpush.msra.mxu1 %v83_v3  ;;  %357 = vmatpush.msra.mxu2 %v83_v3  ;;  %v191_v13 = vld [vmem:[%s648_s2 + $0x30] sm:$0xff]  ;;  %v76_v14 = vld [vmem:[%s649_s1 + $0x38] sm:$0xff]  ;;  %v74_v16 = vld [vmem:[%s649_s1 + $0x28] sm:$0xff] }
   0x6   :  { %358 = vmatpush.msra.mxu3 %v83_v3  ;;  %87 = vmatpush.msra.mxu0 %v82_v4  ;;  %v75_v15 = vld [vmem:[%s649_s1 + $0x30] sm:$0xff]  ;;  %v73_v17 = vld [vmem:[%s649_s1 + $0x20] sm:$0xff]  ;;  %v192_v18 = vld [vmem:[%s648_s2 + $0x38] sm:$0xff] }
   0x7   :  { %359 = vmatpush.msra.mxu1 %v82_v4  ;;  %360 = vmatpush.msra.mxu2 %v82_v4  ;;  %v194_v19 = vld [vmem:[%s648_s2 + $0x48] sm:$0xff]  ;;  %v72_v20 = vld [vmem:[%s649_s1 + $0x18] sm:$0xff]  ;;  %v71_v21 = vld [vmem:[%s649_s1 + $0x10] sm:$0xff] }
   0x8   :  { %361 = vmatpush.msra.mxu3 %v82_v4  ;;  %88 = vmatpush.msra.mxu0 %v81_v5  ;;  %v70_v22 = vld [vmem:[%s649_s1 + $0x8] sm:$0xff]  ;;  %v69_v23 = vld [vmem:[%s649_s1] sm:$0xff]  ;;  %v195_v29 = vld [vmem:[%s648_s2 + $0x50] sm:$0xff] }
   0x9   :  { %362 = vmatpush.msra.mxu1 %v81_v5  ;;  %363 = vmatpush.msra.mxu2 %v81_v5  ;;  %v53_v24 = vld [vmem:[%s650_s0] sm:$0xff]  ;;  %v54_v31 = vld [vmem:[%s650_s0 + $0x8] sm:$0xff]  ;;  %v200_v37 = vld [vmem:[%s648_s2 + $0x78] sm:$0xff] }
   0xa   :  { %364 = vmatpush.msra.mxu3 %v81_v5  ;;  %229 = vperm.xlu1 %403, %v187_v6   ;;  %v57_v25 = vld [vmem:[%s650_s0 + $0x20] sm:$0xff]  ;;  %v58_v32 = vld [vmem:[%s650_s0 + $0x28] sm:$0xff]  ;;  %v55_v38 = vld [vmem:[%s650_s0 + $0x10] sm:$0xff] }
   0xb   :  { %224 = vperm.xlu0 %402, %v186_v7   ;;  %89 = vmatpush.msra.mxu0 %v80_v8  ;;  %v61_v26 = vld [vmem:[%s650_s0 + $0x40] sm:$0xff]  ;;  %v62_v33 = vld [vmem:[%s650_s0 + $0x48] sm:$0xff]  ;;  %v59_v39 = vld [vmem:[%s650_s0 + $0x30] sm:$0xff] }
   0xc   :  { %365 = vmatpush.msra.mxu1 %v80_v8  ;;  %366 = vmatpush.msra.mxu2 %v80_v8  ;;  %v65_v27 = vld [vmem:[%s650_s0 + $0x60] sm:$0xff]  ;;  %v66_v34 = vld [vmem:[%s650_s0 + $0x68] sm:$0xff]  ;;  %v63_v40 = vld [vmem:[%s650_s0 + $0x50] sm:$0xff] }
   0xd   :  { %367 = vmatpush.msra.mxu3 %v80_v8  ;;  %90 = vmatpush.msra.mxu0 %v79_v9  ;;  %v189_v28 = vld [vmem:[%s648_s2 + $0x20] sm:$0xff]  ;;  %v190_v35 = vld [vmem:[%s648_s2 + $0x28] sm:$0xff]  ;;  %v67_v41 = vld [vmem:[%s650_s0 + $0x70] sm:$0xff] }
   0xe   :  { %368 = vmatpush.msra.mxu1 %v79_v9  ;;  %369 = vmatpush.msra.mxu2 %v79_v9  ;;  %v197_v30 = vld [vmem:[%s648_s2 + $0x60] sm:$0xff]  ;;  %v198_v36 = vld [vmem:[%s648_s2 + $0x68] sm:$0xff]  ;;  %v56_v43 = vld [vmem:[%s650_s0 + $0x18] sm:$0xff] }
   0xf   :  { %370 = vmatpush.msra.mxu3 %v79_v9  ;;  %91 = vmatpush.msra.mxu0 %v78_v10  ;;  %v193_v42 = vld [vmem:[%s648_s2 + $0x40] sm:$0xff]  ;;  %v60_v44 = vld [vmem:[%s650_s0 + $0x38] sm:$0xff]  ;;  %v199_v48 = vld [vmem:[%s648_s2 + $0x70] sm:$0xff] }
  0x10   :  { %371 = vmatpush.msra.mxu1 %v78_v10  ;;  %372 = vmatpush.msra.mxu2 %v78_v10  ;;  %v64_v45 = vld [vmem:[%s650_s0 + $0x58] sm:$0xff]  ;;  %v582_v58 = vld [vmem:[%s651_s3] ss:$0 sm:$0xff] }
  0x11   :  { %373 = vmatpush.msra.mxu3 %v78_v10  ;;  %92 = vmatpush.msra.mxu0 %v77_v11  ;;  %v68_v46 = vld [vmem:[%s650_s0 + $0x78] sm:$0xff] }
  0x12   :  { %374 = vmatpush.msra.mxu1 %v77_v11  ;;  %375 = vmatpush.msra.mxu2 %v77_v11  ;;  %v196_v47 = vld [vmem:[%s648_s2 + $0x58] sm:$0xff] }
  0x13   :  { %376 = vmatpush.msra.mxu3 %v77_v11  ;;  %234 = vperm.xlu1 %403, %v188_v12  }
  0x14   :  { %249 = vperm.xlu0 %402, %v191_v13   ;;  %93 = vmatpush.msra.mxu0 %v76_v14 }
  0x15   :  { %377 = vmatpush.msra.mxu1 %v76_v14  ;;  %378 = vmatpush.msra.mxu2 %v76_v14 }
  0x16   :  { %379 = vmatpush.msra.mxu3 %v76_v14  ;;  %94 = vmatpush.msra.mxu0 %v75_v15 }
  0x17   :  { %380 = vmatpush.msra.mxu1 %v75_v15  ;;  %381 = vmatpush.msra.mxu2 %v75_v15 }
  0x18   :  { %382 = vmatpush.msra.mxu3 %v75_v15  ;;  %95 = vmatpush.msra.mxu0 %v74_v16 }
  0x19   :  { %383 = vmatpush.msra.mxu1 %v74_v16  ;;  %384 = vmatpush.msra.mxu2 %v74_v16 }
  0x1a   :  { %385 = vmatpush.msra.mxu3 %v74_v16  ;;  %96 = vmatpush.msra.mxu0 %v73_v17 }
  0x1b   :  { %386 = vmatpush.msra.mxu1 %v73_v17  ;;  %387 = vmatpush.msra.mxu2 %v73_v17 }
  0x1c   :  { %388 = vmatpush.msra.mxu3 %v73_v17  ;;  %254 = vperm.xlu1 %403, %v192_v18  }
  0x1d   :  { %264 = vperm.xlu0 %402, %v194_v19   ;;  %97 = vmatpush.msra.mxu0 %v72_v20 }
  0x1e   :  { %389 = vmatpush.msra.mxu1 %v72_v20  ;;  %390 = vmatpush.msra.mxu2 %v72_v20 }
  0x1f   :  { %391 = vmatpush.msra.mxu3 %v72_v20  ;;  %98 = vmatpush.msra.mxu0 %v71_v21 }
  0x20   :  { %392 = vmatpush.msra.mxu1 %v71_v21  ;;  %393 = vmatpush.msra.mxu2 %v71_v21 }
  0x21   :  { %394 = vmatpush.msra.mxu3 %v71_v21  ;;  %99 = vmatpush.msra.mxu0 %v70_v22 }
  0x22   :  { %395 = vmatpush.msra.mxu1 %v70_v22  ;;  %396 = vmatpush.msra.mxu2 %v70_v22 }
  0x23   :  { %397 = vmatpush.msra.mxu3 %v70_v22  ;;  %100 = vmatpush.msra.mxu0 %v69_v23 }
  0x24   :  { %398 = vmatpush.msra.mxu1 %v69_v23  ;;  %399 = vmatpush.msra.mxu2 %v69_v23 }
  0x25   :  { %400 = vmatpush.msra.mxu3 %v69_v23  ;;  %404 = vset.pattern.permute.xlu2 %v406_v0 }
  0x26   :  { %101 = vmatmul.f32.vlgmr.msra.gmra.mxu0 %v53_v24  ;;  %113 = vmatmul.f32.vlgmr.msra.gmra.mxu1 %v57_v25 }
  0x27   :  { %125 = vmatmul.f32.vlgmr.msra.gmra.mxu2 %v61_v26  ;;  %137 = vmatmul.f32.vlgmr.msra.gmra.mxu3 %v65_v27 }
  0x28   :  { %239 = vperm.xlu2 %404, %v189_v28   ;;  %269 = vperm.xlu1 %403, %v195_v29  }
  0x29   :  { %279 = vperm.xlu0 %402, %v197_v30  }
  0x2e   :  { %104 = vmatmul.f32.gmra.mxu0 %v54_v31  ;;  %116 = vmatmul.f32.gmra.mxu1 %v58_v32 }
  0x2f   :  { %128 = vmatmul.f32.gmra.mxu2 %v62_v33  ;;  %140 = vmatmul.f32.gmra.mxu3 %v66_v34 }
  0x30   :  { %244 = vperm.xlu2 %404, %v190_v35   ;;  %284 = vperm.xlu1 %403, %v198_v36  }
  0x31   :  { %294 = vperm.xlu0 %402, %v200_v37  }
  0x36   :  { %107 = vmatmul.f32.gmra.mxu0 %v55_v38  ;;  %119 = vmatmul.f32.gmra.mxu1 %v59_v39 }
  0x37   :  { %131 = vmatmul.f32.gmra.mxu2 %v63_v40  ;;  %143 = vmatmul.f32.gmra.mxu3 %v67_v41 }
  0x38   :  { %259 = vperm.xlu2 %404, %v193_v42  }
  0x3e   :  { %110 = vmatmul.f32.gmra.mxu0 %v56_v43  ;;  %122 = vmatmul.f32.gmra.mxu1 %v60_v44 }
  0x3f   :  { %134 = vmatmul.f32.gmra.mxu2 %v64_v45  ;;  %146 = vmatmul.f32.gmra.mxu3 %v68_v46 }
  0x40   :  { %274 = vperm.xlu2 %404, %v196_v47  }
  0x48   :  { %289 = vperm.xlu2 %404, %v199_v48  }
  0x74   :  { %v220_v49 = vpop.permute.xlu0 %219 }
  0x7c   :  { %v230_v50 = vpop.permute.xlu1 %229 }
  0x7d   :  { %v225_v51 = vpop.permute.xlu0 %224 }
  0x82   :  { %v240_v52 = vpop.permute.xlu2 %239 }
  0x85   :  { %v235_v53 = vpop.permute.xlu1 %234 }
  0x86   :  { %v250_v54 = vpop.permute.xlu0 %249 }
  0x8a   :  { %v245_v55 = vpop.permute.xlu2 %244 }
  0x8e   :  { %v255_v56 = vpop.permute.xlu1 %254 }
  0x8f   :  { %v265_v57 = vpop.permute.xlu0 %264 }
  0x92   :  { %v260_v62 = vpop.permute.xlu2 %259 }
  0x9a   :  { %v270_v1 = vpop.permute.xlu1 %269  ;;  %v275_v15 = vpop.permute.xlu2 %274 }
  0x9b   :  { %v280_v3 = vpop.permute.xlu0 %279 }
  0xa2   :  { %v285_v17 = vpop.permute.xlu1 %284  ;;  %v290_v30 = vpop.permute.xlu2 %289 }
  0xa3   :  { %v102_v59 = vpop.f32.mrf.mxu0  ;;  %v114_v61 = vpop.f32.mrf.mxu1 }
  0xa4   :  { %v297_v60 = vmul.f32 %v220_v49, %v102_v59  ;;  %v301_v63 = vmul.f32 %v240_v52, %v114_v61  ;;  %v295_v43 = vpop.permute.xlu0 %294 }
  0xa6   :  { %v317_v0 = vadd.f32 %v582_v58, %v297_v60  ;;  %v321_v2 = vadd.f32 %v582_v58, %v301_v63 }
  0xa8   :  { %333 = vst [vmem:[%s652_s4] sm:$0xff] %v317_v0 }
  0xa9   :  { %337 = vst [vmem:[%s652_s4 + $0x20] sm:$0xff] %v321_v2 }
  0xaa   :  { %v126_v4 = vpop.f32.mrf.mxu2  ;;  %v138_v5 = vpop.f32.mrf.mxu3 }
  0xab   :  { %v305_v6 = vmul.f32 %v260_v62, %v126_v4  ;;  %v309_v7 = vmul.f32 %v280_v3, %v138_v5  ;;  %v105_v8 = vpop.f32.mrf.mxu0  ;;  %v117_v10 = vpop.f32.mrf.mxu1 }
  0xac   :  { %v298_v9 = vmul.f32 %v225_v51, %v105_v8  ;;  %v302_v13 = vmul.f32 %v245_v55, %v117_v10 }
  0xad   :  { %v325_v11 = vadd.f32 %v582_v58, %v305_v6  ;;  %v329_v12 = vadd.f32 %v582_v58, %v309_v7 }
  0xae   :  { %v318_v14 = vadd.f32 %v582_v58, %v298_v9  ;;  %v322_v16 = vadd.f32 %v582_v58, %v302_v13 }
  0xaf   :  { %341 = vst [vmem:[%s652_s4 + $0x40] sm:$0xff] %v325_v11 }
  0xb0   :  { %345 = vst [vmem:[%s652_s4 + $0x60] sm:$0xff] %v329_v12 }
  0xb1   :  { %334 = vst [vmem:[%s652_s4 + $0x8] sm:$0xff] %v318_v14 }
  0xb2   :  { %338 = vst [vmem:[%s652_s4 + $0x28] sm:$0xff] %v322_v16  ;;  %v129_v18 = vpop.f32.mrf.mxu2  ;;  %v141_v19 = vpop.f32.mrf.mxu3 }
  0xb3   :  { %v306_v20 = vmul.f32 %v265_v57, %v129_v18  ;;  %v310_v21 = vmul.f32 %v285_v17, %v141_v19  ;;  %v108_v22 = vpop.f32.mrf.mxu0  ;;  %v120_v24 = vpop.f32.mrf.mxu1 }
  0xb4   :  { %v299_v23 = vmul.f32 %v230_v50, %v108_v22  ;;  %v303_v27 = vmul.f32 %v250_v54, %v120_v24 }
  0xb5   :  { %v326_v25 = vadd.f32 %v582_v58, %v306_v20  ;;  %v330_v26 = vadd.f32 %v582_v58, %v310_v21 }
  0xb6   :  { %v319_v28 = vadd.f32 %v582_v58, %v299_v23  ;;  %v323_v29 = vadd.f32 %v582_v58, %v303_v27 }
  0xb7   :  { %342 = vst [vmem:[%s652_s4 + $0x48] sm:$0xff] %v326_v25 }
  0xb8   :  { %346 = vst [vmem:[%s652_s4 + $0x68] sm:$0xff] %v330_v26 }
  0xb9   :  { %335 = vst [vmem:[%s652_s4 + $0x10] sm:$0xff] %v319_v28 }
  0xba   :  { %339 = vst [vmem:[%s652_s4 + $0x30] sm:$0xff] %v323_v29  ;;  %v132_v31 = vpop.f32.mrf.mxu2  ;;  %v144_v32 = vpop.f32.mrf.mxu3 }
  0xbb   :  { %v307_v33 = vmul.f32 %v270_v1, %v132_v31  ;;  %v311_v34 = vmul.f32 %v290_v30, %v144_v32  ;;  %v111_v35 = vpop.f32.mrf.mxu0  ;;  %v123_v37 = vpop.f32.mrf.mxu1 }
  0xbc   :  { %v300_v36 = vmul.f32 %v235_v53, %v111_v35  ;;  %v304_v40 = vmul.f32 %v255_v56, %v123_v37 }
  0xbd   :  { %v327_v38 = vadd.f32 %v582_v58, %v307_v33  ;;  %v331_v39 = vadd.f32 %v582_v58, %v311_v34 }
  0xbe   :  { %v320_v41 = vadd.f32 %v582_v58, %v300_v36  ;;  %v324_v42 = vadd.f32 %v582_v58, %v304_v40 }
  0xbf   :  { %343 = vst [vmem:[%s652_s4 + $0x50] sm:$0xff] %v327_v38 }
  0xc0   :  { %347 = vst [vmem:[%s652_s4 + $0x70] sm:$0xff] %v331_v39 }
  0xc1   :  { %336 = vst [vmem:[%s652_s4 + $0x18] sm:$0xff] %v320_v41 }
  0xc2   :  { %340 = vst [vmem:[%s652_s4 + $0x38] sm:$0xff] %v324_v42  ;;  %v135_v44 = vpop.f32.mrf.mxu2  ;;  %v147_v45 = vpop.f32.mrf.mxu3 }
  0xc3   :  { %v308_v46 = vmul.f32 %v275_v15, %v135_v44  ;;  %v312_v47 = vmul.f32 %v295_v43, %v147_v45 }
  0xc5   :  { %v328_v48 = vadd.f32 %v582_v58, %v308_v46  ;;  %v332_v49 = vadd.f32 %v582_v58, %v312_v47 }
  0xc7   :  { %344 = vst [vmem:[%s652_s4 + $0x58] sm:$0xff] %v328_v48 }
  0xc8   :  { %348 = vst [vmem:[%s652_s4 + $0x78] sm:$0xff] %v332_v49 }

</bundles_post_ra>
